<compile_context>
chip_gen: v7x
topology: tpu7x:2x2x1
jax: 0.10.0
libtpu: 0.0.40
codegen_flags: <defaults>
</compile_context>

<pallas_src>
import math

import numpy as np
import jax
import jax.numpy as jnp
from jax.experimental import pallas as pl
from jax.experimental.pallas import tpu as pltpu


# ----------------------------------------------------------------------------
# Trace-time constant construction (numpy only — nothing computed in-kernel).
# ----------------------------------------------------------------------------
def _binomial_filter_1d(filt_size):
    taps = {
        1: [1.0],
        2: [1.0, 1.0],
        3: [1.0, 2.0, 1.0],
        4: [1.0, 3.0, 3.0, 1.0],
        5: [1.0, 4.0, 6.0, 4.0, 1.0],
        6: [1.0, 5.0, 10.0, 10.0, 5.0, 1.0],
        7: [1.0, 6.0, 15.0, 20.0, 15.0, 6.0, 1.0],
    }
    return np.asarray(taps[filt_size], dtype=np.float64)


def _pad_index(i, size, pad_type):
    """Map a padded-coordinate index to an input index (None => zero padding)."""
    if 0 <= i < size:
        return i
    if pad_type in ("refl", "reflect"):
        return -i if i < 0 else 2 * size - 2 - i          # matches ReflectionPad2d
    if pad_type in ("repl", "replicate"):
        return min(max(i, 0), size - 1)
    if pad_type == "zero":
        return None
    raise ValueError(f"unsupported pad_type {pad_type!r}")


def _downsample_matrix(size, filt_size, stride, pad_off, pad_type):
    """M (out, size) such that M @ v == 1-D pad -> binomial blur -> stride of v."""
    a = _binomial_filter_1d(filt_size)
    a = a / a.sum()                                        # per-axis normalization
    pad_l = int(1.0 * (filt_size - 1) / 2) + pad_off
    pad_r = int(math.ceil(1.0 * (filt_size - 1) / 2)) + pad_off
    padded = size + pad_l + pad_r
    out_size = (padded - filt_size) // stride + 1
    m = np.zeros((out_size, size), dtype=np.float32)
    for o in range(out_size):
        for d in range(filt_size):
            src = _pad_index(o * stride + d - pad_l, size, pad_type)
            if src is not None:
                m[o, src] += a[d]
    return m


# ----------------------------------------------------------------------------
# Pallas kernel: one (n, c) plane per grid step, out = A @ x @ B on the MXU.
# ----------------------------------------------------------------------------
def downsample_kernel(a_ref, x_ref, b_ref, o_ref):
    y = jnp.dot(a_ref[...], x_ref[...], preferred_element_type=jnp.float32)   # (H_out, W)
    o_ref[...] = jnp.dot(y, b_ref[...],
                         preferred_element_type=jnp.float32).astype(o_ref.dtype)


def downsample_forward(x, *, filt_size=3, stride=2, pad_off=0, pad_type="reflect"):
    """x: (N, C, H, W). Returns (N, C, H_out, W_out), matching the PyTorch module."""
    N, C, H, W = x.shape
    A = _downsample_matrix(H, filt_size, stride, pad_off, pad_type)            # (H_out, H)
    B = _downsample_matrix(W, filt_size, stride, pad_off, pad_type).T          # (W, W_out)
    H_out, W_out = A.shape[0], B.shape[1]

    nc = N * C
    x_f = x.astype(jnp.float32).reshape(nc, H, W)
    a_j = jnp.asarray(A, dtype=jnp.float32)
    b_j = jnp.asarray(B, dtype=jnp.float32)

    # Advisory cost so XLA doesn't over-serialize around this tiny custom call.
    flops = 2 * nc * (H_out * H * W + H_out * W * W_out)
    bytes_accessed = 4 * (nc * H * W + nc * H_out * W_out + A.size + B.size)

    out = pl.pallas_call(
        downsample_kernel,
        out_shape=jax.ShapeDtypeStruct((nc, H_out, W_out), jnp.float32),
        grid=(nc,),
        in_specs=[
            pl.BlockSpec((H_out, H), lambda i: (0, 0)),        # A: VMEM-resident
            pl.BlockSpec((None, H, W), lambda i: (i, 0, 0)),   # one channel-plane
            pl.BlockSpec((W, W_out), lambda i: (0, 0)),        # B: VMEM-resident
        ],
        out_specs=pl.BlockSpec((None, H_out, W_out), lambda i: (i, 0, 0)),
        compiler_params=pltpu.CompilerParams(
            dimension_semantics=("parallel",)),
        cost_estimate=pl.CostEstimate(
            flops=flops, transcendentals=0, bytes_accessed=bytes_accessed),
    )(a_j, x_f, b_j)

    return out.reshape(N, C, H_out, W_out).astype(x.dtype)


# ----------------------------------------------------------------------------
# Pure-JAX reference (pad -> depthwise conv2d), mirroring the PyTorch module.
# ----------------------------------------------------------------------------
def reference_downsample(x, *, filt_size=3, stride=2, pad_off=0, pad_type="reflect"):
    N, C, H, W = x.shape
    a = _binomial_filter_1d(filt_size)
    filt = np.outer(a, a)
    filt = filt / filt.sum()
    pad_l = int(1.0 * (filt_size - 1) / 2) + pad_off
    pad_r = int(math.ceil(1.0 * (filt_size - 1) / 2)) + pad_off
    mode = {"reflect": "reflect", "refl": "reflect",
            "replicate": "edge", "repl": "edge", "zero": "constant"}[pad_type]
    xp = jnp.pad(x, ((0, 0), (0, 0), (pad_l, pad_r), (pad_l, pad_r)), mode=mode)
    if filt_size == 1 and pad_off == 0:
        return x[:, :, ::stride, ::stride]
    w = jnp.asarray(np.tile(filt[None, None], (C, 1, 1, 1)), jnp.float32)      # (C,1,k,k)
    return jax.lax.conv_general_dilated(
        xp.astype(jnp.float32), w, window_strides=(stride, stride),
        padding="VALID", dimension_numbers=("NCHW", "OIHW", "NCHW"),
        feature_group_count=C)


if __name__ == "__main__":
    key = jax.random.PRNGKey(0)
    x = jax.random.normal(key, (2, 4, 16, 16), dtype=jnp.float32)

    out = downsample_forward(x)          # defaults: reflect pad, filt_size=3, stride=2
    out = jax.block_until_ready(out)

    ref = reference_downsample(x)
    assert out.shape == (2, 4, 8, 8), out.shape
    max_err = float(jnp.max(jnp.abs(out - ref)))
    assert max_err < 1e-4, max_err

    print("KERNEL_OK")
</pallas_src>

<mosaic_0001>
module attributes {stable_mosaic.version = 11 : i64} {
  func.func @downsample_kernel(%arg0: i32, %arg1: memref<8x16xf32, #tpu.memory_space<vmem>>, %arg2: memref<1x16x16xf32, #tpu.memory_space<vmem>>, %arg3: memref<16x8xf32, #tpu.memory_space<vmem>>, %arg4: memref<1x8x8xf32, #tpu.memory_space<vmem>>) attributes {dimension_semantics = [#tpu.dimension_semantics<parallel>], iteration_bounds = array<i64: 8>, scalar_prefetch = 0 : i64, scratch_operands = 0 : i64, tpu.core_type = #tpu.core_type<tc>, window_params = [{pipeline_mode = #tpu.pipeline_mode<synchronous>, transform_indices = @transform_0, window_bounds = array<i64: 8, 16>}, {transform_indices = @transform_1, window_bounds = array<i64: 1, 16, 16>}, {pipeline_mode = #tpu.pipeline_mode<synchronous>, transform_indices = @transform_2, window_bounds = array<i64: 16, 8>}, {transform_indices = @transform_3, window_bounds = array<i64: 1, 8, 8>}]} {
    %c0 = arith.constant 0 : index
    %c0_0 = arith.constant 0 : index
    %0 = vector.load %arg1[%c0, %c0_0] : memref<8x16xf32, #tpu.memory_space<vmem>>, vector<8x16xf32>
    %c0_1 = arith.constant 0 : index
    %c0_2 = arith.constant 0 : index
    %c0_3 = arith.constant 0 : index
    %1 = vector.load %arg2[%c0_1, %c0_2, %c0_3] : memref<1x16x16xf32, #tpu.memory_space<vmem>>, vector<1x16x16xf32>
    %2 = vector.shape_cast %1 : vector<1x16x16xf32> to vector<16x16xf32>
    %cst = arith.constant dense<0.000000e+00> : vector<8x16xf32>
    %3 = tpu.matmul %0, %2, %cst {dimension_numbers = #tpu.dot_dimension_numbers<[1], [0], [0], [1], [0, 0, 1, 1], [], []>} : vector<8x16xf32>, vector<16x16xf32>, vector<8x16xf32> -> vector<8x16xf32>
    %c0_4 = arith.constant 0 : index
    %c0_5 = arith.constant 0 : index
    %4 = vector.load %arg3[%c0_4, %c0_5] : memref<16x8xf32, #tpu.memory_space<vmem>>, vector<16x8xf32>
    %cst_6 = arith.constant dense<0.000000e+00> : vector<8x8xf32>
    %5 = tpu.matmul %3, %4, %cst_6 {dimension_numbers = #tpu.dot_dimension_numbers<[1], [0], [0], [1], [0, 0, 1, 1], [], []>} : vector<8x16xf32>, vector<16x8xf32>, vector<8x8xf32> -> vector<8x8xf32>
    %c0_7 = arith.constant 0 : index
    %c0_8 = arith.constant 0 : index
    %c0_9 = arith.constant 0 : index
    %6 = vector.load %arg4[%c0_7, %c0_8, %c0_9] : memref<1x8x8xf32, #tpu.memory_space<vmem>>, vector<1x8x8xf32>
    %7 = vector.shape_cast %6 : vector<1x8x8xf32> to vector<8x8xf32>
    %8 = vector.shape_cast %5 : vector<8x8xf32> to vector<1x8x8xf32>
    tpu.vector_store %arg4[%c0_7, %c0_8, %c0_9], %8 {strides = array<i32>} : memref<1x8x8xf32, #tpu.memory_space<vmem>>, vector<1x8x8xf32>,
    return
  }
  func.func @transform_0(%arg0: i32) -> (i32, i32) {
    %c0_i32 = arith.constant 0 : i32
    %c0_i32_0 = arith.constant 0 : i32
    %c0_i32_1 = arith.constant 0 : i32
    return %c0_i32, %c0_i32_0 : i32, i32
  }
  func.func @transform_1(%arg0: i32) -> (i32, i32, i32) {
    %c0_i32 = arith.constant 0 : i32
    %c0_i32_0 = arith.constant 0 : i32
    %c0_i32_1 = arith.constant 0 : i32
    return %arg0, %c0_i32, %c0_i32_0 : i32, i32, i32
  }
  func.func @transform_2(%arg0: i32) -> (i32, i32) {
    %c0_i32 = arith.constant 0 : i32
    %c0_i32_0 = arith.constant 0 : i32
    %c0_i32_1 = arith.constant 0 : i32
    return %c0_i32, %c0_i32_0 : i32, i32
  }
  func.func @transform_3(%arg0: i32) -> (i32, i32, i32) {
    %c0_i32 = arith.constant 0 : i32
    %c0_i32_0 = arith.constant 0 : i32
    %c0_i32_1 = arith.constant 0 : i32
    return %arg0, %c0_i32, %c0_i32_0 : i32, i32, i32
  }
}

</mosaic_0001>

<bundles_post_ra>
// kernel: tpu_custom_call.1
= control target key start
LH: loop header
LB: loop body
LE: loop exit
PB: predicated region body
PF: predicated region fallthrough
CT: control target
= control target key end

     0   :  { %8 = vsyncpa [#allocation3], 0  ;;  %s813_s0 = inlined_call_operand.vmem [shape: f32[8,16], index: 0, kind: input, shape index: {}]   ;;  %s814_s1 = inlined_call_operand.hbm [shape: f32[8,16,16], index: 1, kind: input, shape index: {}]   ;;  %s815_s2 = inlined_call_operand.vmem [shape: f32[16,8], index: 2, kind: input, shape index: {}]   ;;  %s816_s3 = inlined_call_operand.hbm [shape: f32[8,8,8], index: 3, kind: output, shape index: {}]  }
   0x1   :  { %10 = vsyncpa [#allocation3 + $0x1], 0 }
   0x2   :  { %11 = vsyncpa [#allocation4], 0 }
   0x3   :  { %13 = vsyncpa [#allocation4 + $0x1], 0  ;;  %s645_s12 = smov 0   ;;  %s647_s13 = smov 0  }
   0x4   :  { %s649_s14 = smov 0   ;;  %s651_s15 = smov 0  }
   0x5 LB: > { %s666_s16 = sadd.s32 4294967295, %s616_s15   ;;  %s427_s17 = sadd.s32 4294967294, %s616_s15   ;;  %s616_s15 = sphi %s651_s15, %s828_s15   ;;  %s612_s14 = sphi %s649_s14, %s827_s14   ;;  %s608_s13 = sphi %s647_s13, %s826_s13   ;;  %s604_s12 = sphi %s645_s12, %s825_s12  }
   0x6   : > { %s670_s18 = sadd.s32 1, %s616_s15   ;;  %s47_s19 = sadd.s32 1, %s612_s14 }
   0x7   : > { %s44_s20 = ssub.s32 %s616_s15, %s670_s18  ;;  %p54_p0 = scmp.ne.s32.totalorder %s612_s14, %s608_s13 }
   0x8   : > { %p45_p1 = scmp.eq.s32.totalorder %s44_s20, 0  ;;  %p55_p2 = scmp.eq.s32.totalorder %s616_s15, 0 }
   0x9   : > { %p60_p3 = scmp.ne.s32.totalorder %s608_s13, %s604_s12  ;;  %p61_p4 = scmp.eq.s32.totalorder %s666_s16, 0 }
   0xa   : > { %s682_s21 = scalar_select %p45_p1, %s612_s14, %s47_s19  }
   0xb   : > { %p684_p5 = por %p55_p2, %p54_p0  ;;  %p688_p6 = por %p61_p4, %p60_p3 }
   0xc   : > { %p105_p7 = scmp.eq.s32.totalorder %s666_s16, 7  ;;  %p111_p8 = scmp.eq.s32.totalorder %s427_s17, 7 }
   0xd   : > { %p481_p9 = scmp.lt.s32.totalorder %s616_s15, 8  ;;  %s137_s26 = sand.u32 1, %s612_s14  }
   0xe   : > { %p694_p10 = por %p105_p7, %p54_p0  ;;  %p698_p11 = por %p111_p8, %p60_p3 }
   0xf   : > { %s442_s27 = sshll.u32 %s616_s15, 8  ;;  %s430_s28 = sshll.u32 %s137_s26, 4 }
  0x10   : > { %s820_s24 = scalar_select %p694_p10, 1, 0 }
  0x11   : > { %s821_s25 = scalar_select %p698_p11, 1, 0 }
  0x12   : > { %s707_s4 = scalar_lea.hbm %s814_s1, %s442_s27  ;;  %s141_s5 = scalar_lea.vmem [#allocation2], %s430_s28 }
  0x13   : > { %s148_s6 = sshll.u32 %s141_s5, 4  ;;  %p711_p12 = pnand %p481_p9, %p684_p5  ;;  %s715_s6 = int_to_ptr.vmem [resolvable:$true] %s148_s6 }
  0x14   : > { %s717_s8 = scalar_lea.sflag [#allocation3], %s137_s26  ;;  %s520_s9 = scalar_lea.hbm %s707_s4, 256 }
  0x15   : > { %p521_p13 = scmp.ne.s32.totalorder %s707_s4, %s520_s9  ;;  %p522_p0 = pneg %p711_p12 }
  0x16   : > { %s525_s17 = scalar_lea.hbm %s814_s1, 2048  ;;  %p526_p3 = scmp.lt.u32.totalorder %s707_s4, %s814_s1 }
  0x17   : > { %p523_p1 = pnand %p522_p0, %p521_p13  ;;  %p527_p4 = scmp.lt.u32.totalorder %s525_s17, %s520_s9 }
  0x18   : > { %p529_p7 = scmp.lt.u32.totalorder %s520_s9, %s707_s4 }
  0x19   : > { %p524_p2 = pneg %p523_p1  ;;  %p528_p5 = por %p527_p4, %p526_p3 }
  0x1b   : > { %p530_p8 = por %p529_p7, %p528_p5 }
  0x1d   : > { %p531_p9 = pnand %p530_p8, %p524_p2 }
  0x1f   : > { %534 = shalt.err (!%p531_p9)
}
  0x20   : > { %s535_s22 = scalar_lea.vmem %s715_s6, 256  ;;  %s618_s26 = smov [#allocation2]  }
  0x21   : > { %p536_p13 = scmp.ne.s32.totalorder %s715_s6, %s535_s22  ;;  %s540_s27 = sshll.u32 %s618_s26, 4  ;;  %s541_s27 = int_to_ptr.vmem [resolvable:$false] %s540_s27 }
  0x22   : > { %s542_s28 = scalar_lea.vmem %s541_s27, 512  ;;  %p543_p10 = scmp.lt.s32.totalorder %s715_s6, %s541_s27 }
  0x23   : > { %p538_p1 = pnand %p536_p13, %p522_p0  ;;  %p544_p3 = scmp.lt.s32.totalorder %s542_s28, %s535_s22 }
  0x25   : > { %p539_p11 = pneg %p538_p1  ;;  %p545_p4 = por %p544_p3, %p543_p10 }
  0x27   : > { %p546_p5 = pnand %p545_p4, %p539_p11 }
  0x29   : > { %549 = shalt.err (!%p546_p5)
}
  0x2a   : > { %s619_s29 = smov 128   ;;  %s620_s30 = smov 8  }
  0x2b   : > { %476 = dma.hbm_to_vmem [thread:$0]  (!%p711_p12), %s707_s4, 256, %s715_s6, %s717_s8, %s619_s29, %s619_s29, %s620_s30  }
  0x2c   : > { %p433_p0 = scmp.ge.s32.totalorder %s616_s15, 1  ;;  %p156_p2 = scmp.lt.s32.totalorder %s616_s15, 9 }
  0x2e   : > { %p157_p7 = pnand %p433_p0, %p156_p2 }
  0x2f   : > { %s748_s5 = sand.u32 (!%p157_p7), 1, %s608_s13  }
  0x30   : > { %160 = sbr.rel (%p157_p7) target bundleno = 500 (0x1f4), region = 32  ;;  %s434_s9 = sshll.u32 (!%p157_p7), %s748_s5, 4 }
  0x31   : > { %s163_s10 = scalar_lea.sflag (!%p157_p7), [#allocation3], %s748_s5  ;;  %s166_s11 = scalar_lea.vmem (!%p157_p7), [#allocation2], %s434_s9 }
  0x37   : > { %595 = dma.done.wait (%p688_p6), %s163_s10, 256  }
  0x38   : > { %597 = vsyncadd (%p688_p6), %s163_s10, 4294967040  ;;  %v621_v0 = vmov 0.0|0.0   ;;  %vm622_vm0 = vmmov 0   ;;  %v623_v1 = vmov 0.0   ;;  %v190_v2 = vld [vmem:[%s166_s11] sm:$0xff]  ;;  %v191_v3 = vld [vmem:[%s166_s11 + $0x8] sm:$0xff] }
  0x39   : > { %463 = vmatprep.subr.bf16.mxu0 %v621_v0  ;;  %453 = vmatprep.mubr.msk.f32.mxu0 %vm622_vm0, %v623_v1  ;;  %v464_v4 = vpack.c.bf16 %v191_v3, %v190_v2  ;;  %v266_v5 = vld [vmem:[%s815_s2] sm:$0xff]  ;;  %v267_v6 = vld [vmem:[%s815_s2 + $0x8] sm:$0xff]  ;;  %vm192_vm1 = vcmask 130048   ;;  %s435_s19 = sshll.u32 %s748_s5, 3  ;;  %s439_s20 = sshll.u32 %s666_s16, 7  ;;  %vm341_vm2 = vcmask 64512  }
  0x3a   : > { %466 = vmatprep.subr.bf16.mxu1 %v621_v0  ;;  %460 = vmatprep.mubr.msk.f32.mxu1 %vm622_vm0, %v623_v1  ;;  %v467_v7 = vpack.c.bf16 %v267_v6, %v266_v5  ;;  %v189_v8 = vld [vmem:[%s813_s0] sm:$0xff]  ;;  %s188_s22 = scalar_lea.vmem [#allocation5], %s435_s19  ;;  %s770_s29 = scalar_lea.hbm %s816_s3, %s439_s20 }
  0x3b   : > { %465 = vmatpush3.bf16.msra.mxu0 %v464_v4  ;;  %s357_s26 = sshll.u32 %s188_s22, 4  ;;  %s344_s30 = scalar_lea.sflag [#allocation4], %s748_s5  ;;  %s772_s26 = int_to_ptr.vmem [resolvable:$true] %s357_s26 }
  0x3c   : > { %468 = vmatpush3.bf16.msra.mxu1 %v467_v7  ;;  %s550_s9 = scalar_lea.vmem %s772_s26, 128  ;;  %p823_p10 = scmp.ne.s32.totalorder %s820_s24, 0 }
  0x3d   : > { %p551_p6 = scmp.ne.s32.totalorder %s772_s26, %s550_s9  ;;  %s624_s16 = smov [#allocation5]  }
  0x3e   : > { %454 = vmatmul.mubr.msk.f32.vlgmr.msra.gmra.mrb[0].mxu0 %vm192_vm1, %v189_v8  ;;  %s554_s10 = sshll.u32 %s624_s16, 4  ;;  %s555_s10 = int_to_ptr.vmem [resolvable:$false] %s554_s10 }
  0x3f   : > { %p552_p11 = pnand %p551_p6, %p823_p10  ;;  %s556_s11 = scalar_lea.vmem %s555_s10, 256 }
  0x40   : > { %p557_p8 = scmp.lt.s32.totalorder %s772_s26, %s555_s10  ;;  %p558_p9 = scmp.lt.s32.totalorder %s556_s11, %s550_s9 }
  0x41   : > { %p553_p12 = pneg %p552_p11 }
  0x42   : > { %p559_p13 = por %p558_p9, %p557_p8 }
  0x44   : > { %p560_p1 = pnand %p559_p13, %p553_p12 }
 0x111   : > { %v262_v9 = vpop.f32.mrb[0].mxu0 }
 0x112   : > { %v455_v10 = vpop.f32.mrb[1].mxu0  ;;  %461 = vmatmul.mubr.msk.f32.vlgmr.msra.gmra.mrb[0].mxu1 %vm192_vm1, %v262_v9 }
 0x1e5   : > { %v337_v11 = vpop.f32.mrb[0].mxu1 }
 0x1e6   : > { %342 = vst.msk [vmem:[%s188_s22] sm:$0xff] %vm341_vm2, %v337_v11  ;;  %v462_v12 = vpop.f32.mrb[1].mxu1 }
 0x1e7   : > { %563 = shalt.err (!%p560_p1)
}
 0x1e8   : > { %s564_s5 = scalar_lea.hbm %s770_s29, 128  ;;  %s568_s7 = scalar_lea.hbm %s816_s3, 1024 }
 0x1e9   : > { %p565_p3 = scmp.ne.s32.totalorder %s770_s29, %s564_s5  ;;  %p569_p0 = scmp.lt.u32.totalorder %s770_s29, %s816_s3 }
 0x1ea   : > { %p570_p2 = scmp.lt.u32.totalorder %s568_s7, %s564_s5  ;;  %p572_p6 = scmp.lt.u32.totalorder %s564_s5, %s770_s29 }
 0x1eb   : > { %p566_p4 = pnand %p565_p3, %p823_p10 }
 0x1ec   : > { %p571_p7 = por %p570_p2, %p569_p0 }
 0x1ed   : > { %p567_p5 = pneg %p566_p4 }
 0x1ee   : > { %p573_p11 = por %p572_p6, %p571_p7 }
 0x1f0   : > { %p574_p12 = pnand %p573_p11, %p567_p5 }
 0x1f2   : > { %577 = shalt.err (!%p574_p12)
}
 0x1f3   : > { %471 = dma.vmem_to_hbm [thread:$0]  (%p823_p10), %s772_s26, 128, %s770_s29, %s344_s30  }
 0x1f4 PF: > { %p482_p8 = scmp.ge.s32.totalorder %s616_s15, 2  ;;  %s369_s17 = sand.u32 1, %s604_s12  }
 0x1f5   : > { %p824_p9 = scmp.ne.s32.totalorder %s821_s25, 0  ;;  %s370_s19 = scalar_lea.sflag [#allocation4], %s369_s17 }
 0x1f7   : > { %p478_p13 = pnand %p482_p8, %p824_p9 }
 0x1f9   : > { %599 = dma.done.wait (!%p478_p13), %s370_s19, 128  }
 0x1fa   : > { %601 = vsyncadd (!%p478_p13), %s370_s19, 4294967168  ;;  %p16_p1 = scmp.ge.s32.totalorder %s670_s18, 10   ;;  %s825_s12 = smov %s608_s13 }
 0x1fb   : > { %s826_s13 = smov %s612_s14  ;;  %s827_s14 = smov %s682_s21 }
 0x1fc   : > { %s828_s15 = smov %s670_s18  ;;  %18 = sbr.rel (!%p16_p1) target bundleno = 5 (0x5), region = 77 }
 0x203   :  { %375 = vsyncpa [#allocation3], 1 }
 0x204   :  { %377 = vsyncpa [#allocation3 + $0x1], 1 }
 0x205   :  { %378 = vsyncpa [#allocation4], 1 }
 0x206   :  { %380 = vsyncpa [#allocation4 + $0x1], 1 }

</bundles_post_ra>
